<compile_context>
chip_gen: v7x
topology: tpu7x:2x2x1
jax: 0.10.0
libtpu: 0.0.40
codegen_flags: <defaults>
</compile_context>

<pallas_src>
import numpy as np
import jax
import jax.numpy as jnp
from jax.experimental import pallas as pl
from jax.experimental.pallas import tpu as pltpu


def _mlp_kernel(obs_ref, act_ref, w1o_ref, w1a_ref, b1_ref,
                w2_ref, b2_ref, w3_ref, b3_ref, o_ref):
    """Fused (obs, action) -> fc1 -> relu -> fc2 -> relu -> fc3 for one batch tile."""
    # fc1: split-weight form of concat([obs, act]) @ W1 (no wrapper concat).
    h1 = jnp.dot(obs_ref[...], w1o_ref[...], preferred_element_type=jnp.float32)
    h1 = h1 + jnp.dot(act_ref[...], w1a_ref[...],
                      preferred_element_type=jnp.float32)
    h1 = jnp.maximum(h1 + b1_ref[...], 0.0)            # f32 epilogue (v5e-safe)

    # fc2 (dominant FLOPs): compute-dtype MXU matmul, f32 accumulation.
    h2 = jnp.dot(h1.astype(w2_ref.dtype), w2_ref[...],
                 preferred_element_type=jnp.float32)
    h2 = jnp.maximum(h2 + b2_ref[...], 0.0)             # [bt, H] f32

    # fc3: [bt,H] @ [H,1] -> [bt,1]; only the tiny w3 column needs relayout,
    # never the large h2 activation.
    out = jnp.dot(h2.astype(w3_ref.dtype), w3_ref[...],
                  preferred_element_type=jnp.float32)
    o_ref[...] = out + b3_ref[0, 0]                      # scalar bias from SMEM


def prepare_params(params, obs_dim, compute_dtype=jnp.bfloat16):
    """One-time weight prep, hoisted out of the per-call hot path.

    Splits fc1's weight into obs/action halves, reshapes fc3 to a column,
    and casts matmul weights to the compute dtype (biases stay f32)."""
    w1, b1, w2, b2, w3, b3 = params
    H = w1.shape[1]
    cd = compute_dtype
    return (
        jnp.asarray(w1[:obs_dim], cd),                     # w1_obs  [obs_dim, H]
        jnp.asarray(w1[obs_dim:], cd),                     # w1_act  [act_dim, H]
        jnp.asarray(b1, jnp.float32).reshape(1, H),        # b1
        jnp.asarray(w2, cd),                               # w2      [H, H]
        jnp.asarray(b2, jnp.float32).reshape(1, H),        # b2
        jnp.asarray(w3, cd).reshape(H, 1),                 # w3      [H, 1]
        jnp.asarray(b3, jnp.float32).reshape(1, 1),        # b3 scalar (SMEM)
    )


def local_value_net(obs, action, prepared, *, batch_tile=None):
    """obs: [B, obs_dim] f32, action: [B, action_dim] f32 -> [B, 1] f32."""
    w1o, w1a, b1, w2, b2, w3, b3 = prepared
    B, obs_dim = obs.shape
    act_dim = action.shape[-1]
    H = w2.shape[0]
    cd = w2.dtype

    # Batch tiling:
    #   small B -> one full block (no per-step pipeline overhead),
    #   large B -> >= 2 sublane/lane-aligned tiles up to 2048 rows so per-step
    #              compute dwarfs the ~0.35us grid-step overhead and the
    #              "parallel" axis can shard across v7x's two TensorCores.
    #   (On v5e prefer batch_tile in the 512-1024 range.)
    if batch_tile is None:
        if B <= 256:
            batch_tile = B
        else:
            half = -(-B // 2)
            batch_tile = min(2048, ((half + 127) // 128) * 128)
    batch_tile = min(batch_tile, B)
    if batch_tile < B:
        assert batch_tile % 8 == 0, "tiled path needs a sublane-aligned batch tile"
    num_tiles = pl.cdiv(B, batch_tile)   # ragged final tile handled by Pallas

    obs_c = obs.astype(cd)
    act_c = action.astype(cd)

    # Advisory cost hint so XLA schedules neighbors around the custom call.
    itemsize = np.dtype(cd).itemsize
    in_bytes = B * (obs_dim + act_dim) * itemsize
    w_bytes = ((obs_dim + act_dim) * H + H * H + H) * itemsize + (2 * H + 1) * 4
    cost = pl.CostEstimate(
        flops=2 * B * H * (obs_dim + act_dim + H + 1),
        transcendentals=0,
        bytes_accessed=in_bytes + w_bytes + B * 4)

    return pl.pallas_call(
        _mlp_kernel,
        out_shape=jax.ShapeDtypeStruct((B, 1), jnp.float32),
        grid=(num_tiles,),
        in_specs=[
            pl.BlockSpec((batch_tile, obs_dim), lambda i: (i, 0)),   # obs tile
            pl.BlockSpec((batch_tile, act_dim), lambda i: (i, 0)),   # action tile
            pl.BlockSpec((obs_dim, H), lambda i: (0, 0)),            # w1_obs (VMEM-resident)
            pl.BlockSpec((act_dim, H), lambda i: (0, 0)),            # w1_act
            pl.BlockSpec((1, H), lambda i: (0, 0)),                  # b1
            pl.BlockSpec((H, H), lambda i: (0, 0)),                  # w2
            pl.BlockSpec((1, H), lambda i: (0, 0)),                  # b2
            pl.BlockSpec((H, 1), lambda i: (0, 0)),                  # w3 column
            pl.BlockSpec(memory_space=pltpu.MemorySpace.SMEM),       # b3 scalar
        ],
        out_specs=pl.BlockSpec((batch_tile, 1), lambda i: (i, 0)),
        compiler_params=pltpu.CompilerParams(
            dimension_semantics=("parallel",)),
        cost_estimate=cost,
    )(obs_c, act_c, w1o, w1a, b1, w2, b2, w3, b3)


def init_params(key, obs_dim, action_dim, hidden=128):
    """nn.Linear-style U(-1/sqrt(fan_in), 1/sqrt(fan_in)) init.

    Layout: weights [D_in, D_out] (transpose of PyTorch), biases [1, D_out]."""
    d_in = obs_dim + action_dim
    ks = jax.random.split(key, 6)

    def lin(kw, kb, fan_in, fan_out):
        bound = 1.0 / np.sqrt(fan_in)
        w = jax.random.uniform(kw, (fan_in, fan_out), jnp.float32, -bound, bound)
        b = jax.random.uniform(kb, (1, fan_out), jnp.float32, -bound, bound)
        return w, b

    w1, b1 = lin(ks[0], ks[1], d_in, hidden)
    w2, b2 = lin(ks[2], ks[3], hidden, hidden)
    w3, b3 = lin(ks[4], ks[5], hidden, 1)
    return (w1, b1, w2, b2, w3, b3)


def reference(obs, action, params):
    w1, b1, w2, b2, w3, b3 = params
    x = jnp.concatenate([obs, action], axis=-1)
    h1 = jax.nn.relu(x @ w1 + b1)
    h2 = jax.nn.relu(h1 @ w2 + b2)
    return h2 @ w3 + b3


if __name__ == "__main__":
    key = jax.random.PRNGKey(0)
    k_par, k_obs, k_act, k_obs2, k_act2 = jax.random.split(key, 5)

    obs_dim, action_dim = 16, 8
    params = init_params(k_par, obs_dim, action_dim)

    # --- small batch, f32 compute, single-block path, tight tolerance ---
    B = 16
    obs = jax.random.normal(k_obs, (B, obs_dim), jnp.float32)
    action = jax.random.normal(k_act, (B, action_dim), jnp.float32)
    prep_f32 = prepare_params(params, obs_dim, compute_dtype=jnp.float32)
    out = jax.block_until_ready(local_value_net(obs, action, prep_f32))
    ref = jax.block_until_ready(reference(obs, action, params))
    assert out.shape == (B, 1)
    np.testing.assert_allclose(np.asarray(out), np.asarray(ref),
                               rtol=1e-4, atol=1e-4)

    # --- ragged batch, bf16 (default) compute, tiled + boundary-block path ---
    B2 = 300
    obs2 = jax.random.normal(k_obs2, (B2, obs_dim), jnp.float32)
    action2 = jax.random.normal(k_act2, (B2, action_dim), jnp.float32)
    prep_bf16 = prepare_params(params, obs_dim)            # bf16 default
    out2 = jax.block_until_ready(
        local_value_net(obs2, action2, prep_bf16, batch_tile=128))
    ref2 = jax.block_until_ready(reference(obs2, action2, params))
    assert out2.shape == (B2, 1)
    np.testing.assert_allclose(np.asarray(out2), np.asarray(ref2),
                               rtol=5e-2, atol=5e-2)

    # --- default tile selection (>= 2 parallel tiles for v7x megacore) ---
    out3 = jax.block_until_ready(local_value_net(obs2, action2, prep_bf16))
    np.testing.assert_allclose(np.asarray(out3), np.asarray(ref2),
                               rtol=5e-2, atol=5e-2)

    print("KERNEL_OK")
</pallas_src>

<mosaic_0001>
module attributes {stable_mosaic.version = 11 : i64} {
  func.func @_mlp_kernel(%arg0: i32, %arg1: memref<16x16xf32, #tpu.memory_space<vmem>>, %arg2: memref<16x8xf32, #tpu.memory_space<vmem>>, %arg3: memref<16x128xf32, #tpu.memory_space<vmem>>, %arg4: memref<8x128xf32, #tpu.memory_space<vmem>>, %arg5: memref<1x128xf32, #tpu.memory_space<vmem>>, %arg6: memref<128x128xf32, #tpu.memory_space<vmem>>, %arg7: memref<1x128xf32, #tpu.memory_space<vmem>>, %arg8: memref<128x1xf32, #tpu.memory_space<vmem>>, %arg9: memref<1x1xf32, #tpu.memory_space<smem>>, %arg10: memref<16x1xf32, #tpu.memory_space<vmem>>) attributes {dimension_semantics = [#tpu.dimension_semantics<parallel>], iteration_bounds = array<i64: 1>, scalar_prefetch = 0 : i64, scratch_operands = 0 : i64, tpu.core_type = #tpu.core_type<tc>, window_params = [{transform_indices = @transform_0, window_bounds = array<i64: 16, 16>}, {transform_indices = @transform_1, window_bounds = array<i64: 16, 8>}, {pipeline_mode = #tpu.pipeline_mode<synchronous>, transform_indices = @transform_2, window_bounds = array<i64: 16, 128>}, {pipeline_mode = #tpu.pipeline_mode<synchronous>, transform_indices = @transform_3, window_bounds = array<i64: 8, 128>}, {pipeline_mode = #tpu.pipeline_mode<synchronous>, transform_indices = @transform_4, window_bounds = array<i64: 1, 128>}, {pipeline_mode = #tpu.pipeline_mode<synchronous>, transform_indices = @transform_5, window_bounds = array<i64: 128, 128>}, {pipeline_mode = #tpu.pipeline_mode<synchronous>, transform_indices = @transform_6, window_bounds = array<i64: 1, 128>}, {pipeline_mode = #tpu.pipeline_mode<synchronous>, transform_indices = @transform_7, window_bounds = array<i64: 128, 1>}, {transform_indices = @transform_8, window_bounds = array<i64: 1, 1>}, {transform_indices = @transform_9, window_bounds = array<i64: 16, 1>}]} {
    %c0 = arith.constant 0 : index
    %c0_0 = arith.constant 0 : index
    %0 = vector.load %arg1[%c0, %c0_0] : memref<16x16xf32, #tpu.memory_space<vmem>>, vector<16x16xf32>
    %c0_1 = arith.constant 0 : index
    %c0_2 = arith.constant 0 : index
    %1 = vector.load %arg3[%c0_1, %c0_2] : memref<16x128xf32, #tpu.memory_space<vmem>>, vector<16x128xf32>
    %cst = arith.constant dense<0.000000e+00> : vector<16x128xf32>
    %2 = tpu.matmul %0, %1, %cst {dimension_numbers = #tpu.dot_dimension_numbers<[1], [0], [0], [1], [0, 0, 1, 1], [], []>} : vector<16x16xf32>, vector<16x128xf32>, vector<16x128xf32> -> vector<16x128xf32>
    %c0_3 = arith.constant 0 : index
    %c0_4 = arith.constant 0 : index
    %3 = vector.load %arg2[%c0_3, %c0_4] : memref<16x8xf32, #tpu.memory_space<vmem>>, vector<16x8xf32>
    %c0_5 = arith.constant 0 : index
    %c0_6 = arith.constant 0 : index
    %4 = vector.load %arg4[%c0_5, %c0_6] : memref<8x128xf32, #tpu.memory_space<vmem>>, vector<8x128xf32>
    %cst_7 = arith.constant dense<0.000000e+00> : vector<16x128xf32>
    %5 = tpu.matmul %3, %4, %cst_7 {dimension_numbers = #tpu.dot_dimension_numbers<[1], [0], [0], [1], [0, 0, 1, 1], [], []>} : vector<16x8xf32>, vector<8x128xf32>, vector<16x128xf32> -> vector<16x128xf32>
    %6 = arith.addf %2, %5 : vector<16x128xf32>
    %c0_8 = arith.constant 0 : index
    %c0_9 = arith.constant 0 : index
    %7 = vector.load %arg5[%c0_8, %c0_9] : memref<1x128xf32, #tpu.memory_space<vmem>>, vector<1x128xf32>
    %8 = vector.broadcast %7 : vector<1x128xf32> to vector<16x128xf32>
    %9 = arith.addf %6, %8 : vector<16x128xf32>
    %cst_10 = arith.constant 0.000000e+00 : f32
    %10 = vector.broadcast %cst_10 : f32 to vector<16x128xf32>
    %11 = arith.maximumf %9, %10 : vector<16x128xf32>
    %c0_11 = arith.constant 0 : index
    %c0_12 = arith.constant 0 : index
    %12 = vector.load %arg6[%c0_11, %c0_12] : memref<128x128xf32, #tpu.memory_space<vmem>>, vector<128x128xf32>
    %cst_13 = arith.constant dense<0.000000e+00> : vector<16x128xf32>
    %13 = tpu.matmul %11, %12, %cst_13 {dimension_numbers = #tpu.dot_dimension_numbers<[1], [0], [0], [1], [0, 0, 1, 1], [], []>} : vector<16x128xf32>, vector<128x128xf32>, vector<16x128xf32> -> vector<16x128xf32>
    %c0_14 = arith.constant 0 : index
    %c0_15 = arith.constant 0 : index
    %14 = vector.load %arg7[%c0_14, %c0_15] : memref<1x128xf32, #tpu.memory_space<vmem>>, vector<1x128xf32>
    %15 = vector.broadcast %14 : vector<1x128xf32> to vector<16x128xf32>
    %16 = arith.addf %13, %15 : vector<16x128xf32>
    %cst_16 = arith.constant 0.000000e+00 : f32
    %17 = vector.broadcast %cst_16 : f32 to vector<16x128xf32>
    %18 = arith.maximumf %16, %17 : vector<16x128xf32>
    %c0_17 = arith.constant 0 : index
    %c0_18 = arith.constant 0 : index
    %19 = vector.load %arg8[%c0_17, %c0_18] : memref<128x1xf32, #tpu.memory_space<vmem>>, vector<128x1xf32>
    %cst_19 = arith.constant dense<0.000000e+00> : vector<16x1xf32>
    %20 = tpu.matmul %18, %19, %cst_19 {dimension_numbers = #tpu.dot_dimension_numbers<[1], [0], [0], [1], [0, 0, 1, 1], [], []>} : vector<16x128xf32>, vector<128x1xf32>, vector<16x1xf32> -> vector<16x1xf32>
    %c0_20 = arith.constant 0 : index
    %c0_21 = arith.constant 0 : index
    %21 = memref.load %arg9[%c0_20, %c0_21] : memref<1x1xf32, #tpu.memory_space<smem>>
    %22 = vector.broadcast %21 : f32 to vector<16x1xf32>
    %23 = arith.addf %20, %22 : vector<16x1xf32>
    %c0_22 = arith.constant 0 : index
    %c0_23 = arith.constant 0 : index
    %24 = vector.load %arg10[%c0_22, %c0_23] : memref<16x1xf32, #tpu.memory_space<vmem>>, vector<16x1xf32>
    tpu.vector_store %arg10[%c0_22, %c0_23], %23 {strides = array<i32>} : memref<16x1xf32, #tpu.memory_space<vmem>>, vector<16x1xf32>,
    return
  }
  func.func @transform_0(%arg0: i32) -> (i32, i32) {
    %c0_i32 = arith.constant 0 : i32
    %c0_i32_0 = arith.constant 0 : i32
    return %arg0, %c0_i32 : i32, i32
  }
  func.func @transform_1(%arg0: i32) -> (i32, i32) {
    %c0_i32 = arith.constant 0 : i32
    %c0_i32_0 = arith.constant 0 : i32
    return %arg0, %c0_i32 : i32, i32
  }
  func.func @transform_2(%arg0: i32) -> (i32, i32) {
    %c0_i32 = arith.constant 0 : i32
    %c0_i32_0 = arith.constant 0 : i32
    %c0_i32_1 = arith.constant 0 : i32
    return %c0_i32, %c0_i32_0 : i32, i32
  }
  func.func @transform_3(%arg0: i32) -> (i32, i32) {
    %c0_i32 = arith.constant 0 : i32
    %c0_i32_0 = arith.constant 0 : i32
    %c0_i32_1 = arith.constant 0 : i32
    return %c0_i32, %c0_i32_0 : i32, i32
  }
  func.func @transform_4(%arg0: i32) -> (i32, i32) {
    %c0_i32 = arith.constant 0 : i32
    %c0_i32_0 = arith.constant 0 : i32
    %c0_i32_1 = arith.constant 0 : i32
    return %c0_i32, %c0_i32_0 : i32, i32
  }
  func.func @transform_5(%arg0: i32) -> (i32, i32) {
    %c0_i32 = arith.constant 0 : i32
    %c0_i32_0 = arith.constant 0 : i32
    %c0_i32_1 = arith.constant 0 : i32
    return %c0_i32, %c0_i32_0 : i32, i32
  }
  func.func @transform_6(%arg0: i32) -> (i32, i32) {
    %c0_i32 = arith.constant 0 : i32
    %c0_i32_0 = arith.constant 0 : i32
    %c0_i32_1 = arith.constant 0 : i32
    return %c0_i32, %c0_i32_0 : i32, i32
  }
  func.func @transform_7(%arg0: i32) -> (i32, i32) {
    %c0_i32 = arith.constant 0 : i32
    %c0_i32_0 = arith.constant 0 : i32
    %c0_i32_1 = arith.constant 0 : i32
    return %c0_i32, %c0_i32_0 : i32, i32
  }
  func.func @transform_8(%arg0: i32) -> (i32, i32) {
    %c0_i32 = arith.constant 0 : i32
    %c0_i32_0 = arith.constant 0 : i32
    %c0_i32_1 = arith.constant 0 : i32
    return %c0_i32, %c0_i32_0 : i32, i32
  }
  func.func @transform_9(%arg0: i32) -> (i32, i32) {
    %c0_i32 = arith.constant 0 : i32
    %c0_i32_0 = arith.constant 0 : i32
    return %arg0, %c0_i32 : i32, i32
  }
}

</mosaic_0001>

<bundles_post_ra>
// kernel: tpu_custom_call.1
= control target key start
LH: loop header
LB: loop body
LE: loop exit
PB: predicated region body
PF: predicated region fallthrough
CT: control target
= control target key end

     0   :  { %vm40_vm0 = vcmask 64512   ;;  %vm122_vm1 = vcmask 130048   ;;  %vm408_vm2 = vcmask 7168   ;;  %s802_s2 = inlined_call_operand.vmem [shape: f32[16,128], index: 2, kind: input, shape index: {}]   ;;  %s803_s3 = inlined_call_operand.vmem [shape: f32[8,128], index: 3, kind: input, shape index: {}]   ;;  %s804_s1 = inlined_call_operand.vmem [shape: f32[16,8], index: 1, kind: input, shape index: {}]   ;;  %s805_s0 = inlined_call_operand.vmem [shape: f32[16,16], index: 0, kind: input, shape index: {}]   ;;  %s806_s5 = inlined_call_operand.vmem [shape: f32[128,128], index: 5, kind: input, shape index: {}]   ;;  %s807_s7 = inlined_call_operand.vmem [shape: f32[128,1], index: 7, kind: input, shape index: {}]   ;;  %s808_s4 = inlined_call_operand.vmem [shape: f32[1,128], index: 4, kind: input, shape index: {}]   ;;  %s809_s6 = inlined_call_operand.vmem [shape: f32[1,128], index: 6, kind: input, shape index: {}]   ;;  %s810_s8 = inlined_call_operand.<no memory space> [shape: f32[1,1], index: 8, kind: input, shape index: {}]   ;;  %s811_s9 = inlined_call_operand.vmem [shape: f32[16,1], index: 9, kind: output, shape index: {}]  }
   0x1   :  { %v35_v0 = vld [vmem:[%s802_s2] sm:$0xff]  ;;  %v36_v1 = vld [vmem:[%s802_s2 + $0x8] sm:$0xff]  ;;  %v217_v10 = vld [vmem:[%s806_s5 + $0x10] sm:$0xff] }
   0x2   :  { %v39_v2 = vld [vmem:[%s803_s3] sm:$0xff]  ;;  %v546_v3 = vpack.c.bf16 %v36_v1, %v35_v0  ;;  %v38_v5 = vld [vmem:[%s804_s1 + $0x8] sm:$0xff]  ;;  %v218_v11 = vld [vmem:[%s806_s5 + $0x18] sm:$0xff] }
   0x3   :  { %464 = vmatprep.subr.mxu1 %v39_v2  ;;  %v37_v4 = vld [vmem:[%s804_s1] sm:$0xff]  ;;  %v216_v8 = vld [vmem:[%s806_s5 + $0x8] sm:$0xff]  ;;  %v554_v13 = vpack.c.bf16 %v218_v11, %v217_v10  ;;  %v221_v17 = vld [vmem:[%s806_s5 + $0x30] sm:$0xff]  ;;  %v332_v10 = vstv %s810_s8 }
   0x4   :  { %v33_v6 = vld [vmem:[%s805_s0] sm:$0xff]  ;;  %465 = vmatpush3.msra.mxu1 %v39_v2  ;;  %466 = vmatprep.mubr.msk.f32.mxu1 %vm40_vm0, %v37_v4  ;;  %v34_v12 = vld [vmem:[%s805_s0 + $0x8] sm:$0xff]  ;;  %v222_v18 = vld [vmem:[%s806_s5 + $0x38] sm:$0xff] }
   0x5   :  { %v215_v7 = vld [vmem:[%s806_s5] sm:$0xff]  ;;  %547 = vmatprep.subr.bf16.mxu0 %v546_v3  ;;  %467 = vmatmul.mubr.msk.f32.vlgmr.msra.gmra.mrb[0].mxu1 %vm40_vm0, %v38_v5  ;;  %v220_v15 = vld [vmem:[%s806_s5 + $0x28] sm:$0xff]  ;;  %v562_v19 = vpack.c.bf16 %v222_v18, %v221_v17  ;;  %v225_v23 = vld [vmem:[%s806_s5 + $0x50] sm:$0xff] }
   0x6   :  { %v550_v9 = vpack.c.bf16 %v216_v8, %v215_v7  ;;  %549 = vmatpush3.bf16.msra.mxu0 %v546_v3  ;;  %473 = vmatprep.mubr.msk.f32.mxu0 %vm122_vm1, %v33_v6  ;;  %v219_v14 = vld [vmem:[%s806_s5 + $0x20] sm:$0xff]  ;;  %v224_v21 = vld [vmem:[%s806_s5 + $0x48] sm:$0xff]  ;;  %v226_v24 = vld [vmem:[%s806_s5 + $0x58] sm:$0xff] }
   0x7   :  { %v558_v16 = vpack.c.bf16 %v220_v15, %v219_v14  ;;  %v223_v20 = vld [vmem:[%s806_s5 + $0x40] sm:$0xff]  ;;  %v570_v25 = vpack.c.bf16 %v226_v24, %v225_v23  ;;  %v228_v27 = vld [vmem:[%s806_s5 + $0x68] sm:$0xff]  ;;  %v229_v29 = vld [vmem:[%s806_s5 + $0x70] sm:$0xff] }
   0x8   :  { %551 = vmatprep.subr.bf16.mxu1 %v550_v9  ;;  %v566_v22 = vpack.c.bf16 %v224_v21, %v223_v20  ;;  %v227_v26 = vld [vmem:[%s806_s5 + $0x60] sm:$0xff]  ;;  %v230_v30 = vld [vmem:[%s806_s5 + $0x78] sm:$0xff]  ;;  %v316_v33 = vld [vmem:[%s807_s7 + $0x8] sm:$0xff] }
   0x9   :  { %553 = vmatpush3.bf16.msra.mxu1 %v550_v9  ;;  %474 = vmatmul.mubr.msk.f32.vlgmr.msra.gmra.mrb[0].mxu0 %vm122_vm1, %v34_v12  ;;  %v574_v28 = vpack.c.bf16 %v228_v27, %v227_v26  ;;  %v578_v31 = vpack.c.bf16 %v230_v30, %v229_v29  ;;  %v315_v32 = vld [vmem:[%s807_s7] sm:$0xff]  ;;  %v317_v34 = vld [vmem:[%s807_s7 + $0x10] sm:$0xff]  ;;  %v318_v36 = vld [vmem:[%s807_s7 + $0x18] sm:$0xff] }
   0xa   :  { %555 = vmatprep.subr.bf16.mxu1 %v554_v13  ;;  %v582_v35 = vpack.c.bf16 %v316_v33, %v315_v32  ;;  %v586_v37 = vpack.c.bf16 %v318_v36, %v317_v34  ;;  %v319_v38 = vld [vmem:[%s807_s7 + $0x20] sm:$0xff]  ;;  %v320_v39 = vld [vmem:[%s807_s7 + $0x28] sm:$0xff]  ;;  %v321_v41 = vld [vmem:[%s807_s7 + $0x30] sm:$0xff] }
   0xb   :  { %v590_v40 = vpack.c.bf16 %v320_v39, %v319_v38  ;;  %v322_v42 = vld [vmem:[%s807_s7 + $0x38] sm:$0xff]  ;;  %v323_v44 = vld [vmem:[%s807_s7 + $0x40] sm:$0xff]  ;;  %v324_v45 = vld [vmem:[%s807_s7 + $0x48] sm:$0xff] }
   0xc   :  { %583 = vmatprep.subr.bf16.mxu0 %v582_v35  ;;  %v594_v43 = vpack.c.bf16 %v322_v42, %v321_v41  ;;  %v598_v46 = vpack.c.bf16 %v324_v45, %v323_v44  ;;  %v325_v47 = vld [vmem:[%s807_s7 + $0x50] sm:$0xff]  ;;  %v326_v48 = vld [vmem:[%s807_s7 + $0x58] sm:$0xff]  ;;  %v327_v50 = vld [vmem:[%s807_s7 + $0x60] sm:$0xff] }
   0xd   :  { %557 = vmatpush3.bf16.msra.mxu1 %v554_v13  ;;  %585 = vmatpush3.bf16.msra.mxu0 %v582_v35  ;;  %v602_v49 = vpack.c.bf16 %v326_v48, %v325_v47  ;;  %v328_v51 = vld [vmem:[%s807_s7 + $0x68] sm:$0xff]  ;;  %v419_v56 = vld [vmem:[%s808_s4] ss:$0 sm:$0xff]  ;;  %v329_v0 = vld [vmem:[%s807_s7 + $0x70] sm:$0xff] }
   0xe   :  { %559 = vmatprep.subr.bf16.mxu1 %v558_v16  ;;  %587 = vmatprep.subr.bf16.mxu0 %v586_v37  ;;  %v606_v52 = vpack.c.bf16 %v328_v51, %v327_v50  ;;  %v330_v1 = vld [vmem:[%s807_s7 + $0x78] sm:$0xff]  ;;  %v420_v3 = vld [vmem:[%s809_s6] ss:$0 sm:$0xff] }
   0xf   :  { %v610_v2 = vpack.c.bf16 %v330_v1, %v329_v0 }
  0x11   :  { %561 = vmatpush3.bf16.msra.mxu1 %v558_v16  ;;  %589 = vmatpush3.bf16.msra.mxu0 %v586_v37 }
  0x12   :  { %563 = vmatprep.subr.bf16.mxu1 %v562_v19  ;;  %591 = vmatprep.subr.bf16.mxu0 %v590_v40 }
  0x15   :  { %565 = vmatpush3.bf16.msra.mxu1 %v562_v19  ;;  %593 = vmatpush3.bf16.msra.mxu0 %v590_v40 }
  0x16   :  { %567 = vmatprep.subr.bf16.mxu1 %v566_v22  ;;  %595 = vmatprep.subr.bf16.mxu0 %v594_v43 }
  0x19   :  { %569 = vmatpush3.bf16.msra.mxu1 %v566_v22  ;;  %597 = vmatpush3.bf16.msra.mxu0 %v594_v43 }
  0x1a   :  { %571 = vmatprep.subr.bf16.mxu1 %v570_v25  ;;  %599 = vmatprep.subr.bf16.mxu0 %v598_v46 }
  0x1d   :  { %573 = vmatpush3.bf16.msra.mxu1 %v570_v25  ;;  %601 = vmatpush3.bf16.msra.mxu0 %v598_v46 }
  0x1e   :  { %575 = vmatprep.subr.bf16.mxu1 %v574_v28  ;;  %603 = vmatprep.subr.bf16.mxu0 %v602_v49 }
  0x21   :  { %577 = vmatpush3.bf16.msra.mxu1 %v574_v28  ;;  %605 = vmatpush3.bf16.msra.mxu0 %v602_v49 }
  0x22   :  { %579 = vmatprep.subr.bf16.mxu1 %v578_v31  ;;  %607 = vmatprep.subr.bf16.mxu0 %v606_v52 }
  0x25   :  { %581 = vmatpush3.bf16.msra.mxu1 %v578_v31  ;;  %609 = vmatpush3.bf16.msra.mxu0 %v606_v52 }
  0x26   :  { %611 = vmatprep.subr.bf16.mxu0 %v610_v2 }
  0x29   :  { %613 = vmatpush3.bf16.msra.mxu0 %v610_v2 }
  0xd8   :  { %v468_v53 = vpop.f32.mrb[0].mxu1 }
  0xd9   :  { %v113_v54 = vpop.f32.mrb[1].mxu1 }
  0xdc   :  { %v475_v55 = vpop.f32.mrb[0].mxu0 }
  0xdd   :  { %v201_v57 = vadd.f32 %v475_v55, %v468_v53  ;;  %v195_v58 = vpop.f32.mrb[1].mxu0 }
  0xde   :  { %v196_v59 = vadd.f32 %v195_v58, %v113_v54 }
  0xdf   :  { %v212_v60 = vadd.f32 %v419_v56, %v201_v57 }
  0xe0   :  { %v211_v61 = vadd.f32 %v419_v56, %v196_v59 }
  0xe1   :  { %v214_v63 = vmax.f32 %v212_v60, 0.0 }
  0xe2   :  { %v213_v62 = vmax.f32 %v211_v61, 0.0 }
  0xe4   :  { %508 = vmatprep.mubr.f32.mxu1 %v213_v62 }
  0xe5   :  { %509 = vmatmul.mubr.f32.vlgmr.msra.gmra.mrb[2].mxu1 %v214_v63 }
 0x1b8   :  { %v510_v4 = vpop.f32.mrb[2].mxu1 }
 0x1b9   :  { %v310_v5 = vadd.f32 %v510_v4, %v420_v3  ;;  %v304_v6 = vpop.f32.mrb[3].mxu1 }
 0x1ba   :  { %v305_v7 = vadd.f32 %v420_v3, %v304_v6 }
 0x1bb   :  { %v314_v9 = vmax.f32 %v310_v5, 0.0 }
 0x1bc   :  { %v313_v8 = vmax.f32 %v305_v7, 0.0 }
 0x1be   :  { %543 = vmatprep.mubr.f32.mxu0 %v313_v8 }
 0x1bf   :  { %544 = vmatmul.mubr.f32.vlgmr.msra.gmra.mrb[2].mxu0 %v314_v9 }
 0x292   :  { %v545_v11 = vpop.f32.mrb[2].mxu0 }
 0x293   :  { %v405_v12 = vadd.f32 %v545_v11, %v332_v10  ;;  %v399_v13 = vpop.f32.mrb[3].mxu0 }
 0x294   :  { %v400_v14 = vadd.f32 %v399_v13, %v332_v10 }
 0x295   :  { %410 = vst.msk [vmem:[%s811_s9 + $0x8] sm:$0xff] %vm408_vm2, %v405_v12 }
 0x296   :  { %409 = vst.msk [vmem:[%s811_s9] sm:$0xff] %vm408_vm2, %v400_v14 }

</bundles_post_ra>
